<compile_context>
chip_gen: v7x
topology: tpu7x:2x2x1
jax: 0.10.0
libtpu: 0.0.40
codegen_flags: <defaults>
</compile_context>

<pallas_src>
import functools

import jax
import jax.numpy as jnp
from jax.experimental import pallas as pl
from jax.experimental.pallas import tpu as pltpu

H_PAD = 128    # hidden layer padded to full lane width
OUT_PAD = 128  # output padded to full lane width (lane-dense stores)
TB = 128       # batch tile (multiple of 8 f32 sublanes)


def _dqn_kernel(x_ref, w1_ref, b1_ref, w2_ref, b2_ref, o_ref):
    # fc1: bf16 MXU inputs, f32 accumulation.
    x = x_ref[...].astype(jnp.bfloat16)                      # (TB, d_in)
    h = jnp.dot(x, w1_ref[...],
                preferred_element_type=jnp.float32)          # (TB, H_PAD) f32
    # bias + ReLU in f32 on the VPU.
    h = jnp.maximum(h + b1_ref[...], 0.0)
    # out layer: cast h to bf16 only as MXU input, accumulate f32.
    y = jnp.dot(h.astype(jnp.bfloat16), w2_ref[...],
                preferred_element_type=jnp.float32)          # (TB, OUT_PAD)
    o_ref[...] = (y + b2_ref[...]).astype(o_ref.dtype)       # lane-dense store


@functools.partial(jax.jit, static_argnames=("d_output",))
def dqn_forward(state, w1_p, b1_p, w2_p, b2_p, d_output=4):
    """state: (B, d_input) f32; padded params from pad_params(); returns (B, d_output) f32."""
    B, d_in = state.shape
    B_pad = ((B + TB - 1) // TB) * TB
    if B_pad != B:
        state = jnp.pad(state, ((0, B_pad - B), (0, 0)))

    out_padded = pl.pallas_call(
        _dqn_kernel,
        out_shape=jax.ShapeDtypeStruct((B_pad, OUT_PAD), jnp.float32),
        grid=(B_pad // TB,),
        in_specs=[
            pl.BlockSpec((TB, d_in), lambda i: (i, 0)),       # activations: tiled over batch
            pl.BlockSpec((d_in, H_PAD), lambda i: (0, 0)),    # weights replicated / VMEM-resident
            pl.BlockSpec((1, H_PAD), lambda i: (0, 0)),
            pl.BlockSpec((H_PAD, OUT_PAD), lambda i: (0, 0)),
            pl.BlockSpec((1, OUT_PAD), lambda i: (0, 0)),
        ],
        out_specs=pl.BlockSpec((TB, OUT_PAD), lambda i: (i, 0)),
        compiler_params=pltpu.CompilerParams(
            dimension_semantics=("parallel",)),               # shard batch tiles across TCs (v7x)
    )(state, w1_p, b1_p, w2_p, b2_p)

    # Slice padding off before any downstream argmax over Q-values.
    return out_padded[:B, :d_output]


def init_params(key, d_input, d_output, layer1=64):
    """Deterministic init mimicking nn.Linear's U(-1/sqrt(fan_in), 1/sqrt(fan_in))."""
    k1, k2, k3, k4 = jax.random.split(key, 4)
    bound1 = 1.0 / jnp.sqrt(d_input)
    bound2 = 1.0 / jnp.sqrt(layer1)
    w1 = jax.random.uniform(k1, (d_input, layer1), jnp.float32, -bound1, bound1)
    b1 = jax.random.uniform(k2, (layer1,), jnp.float32, -bound1, bound1)
    w2 = jax.random.uniform(k3, (layer1, d_output), jnp.float32, -bound2, bound2)
    b2 = jax.random.uniform(k4, (d_output,), jnp.float32, -bound2, bound2)
    return w1, b1, w2, b2


def pad_params(w1, b1, w2, b2):
    """Zero-pad to lane-dense shapes; weights -> bf16 (halves weight DMA bytes)."""
    d_in, layer1 = w1.shape
    d_out = w2.shape[1]
    w1_p = jnp.zeros((d_in, H_PAD), jnp.float32).at[:, :layer1].set(w1).astype(jnp.bfloat16)
    b1_p = jnp.zeros((1, H_PAD), jnp.float32).at[0, :layer1].set(b1)
    w2_p = jnp.zeros((H_PAD, OUT_PAD), jnp.float32).at[:layer1, :d_out].set(w2).astype(jnp.bfloat16)
    b2_p = jnp.zeros((1, OUT_PAD), jnp.float32).at[0, :d_out].set(b2)
    return w1_p, b1_p, w2_p, b2_p


if __name__ == "__main__":
    key = jax.random.PRNGKey(0)
    d_input, d_output, layer1 = 16, 4, 64
    batch = 256  # >=128 rows per call so the kernel is not launch-latency bound

    pkey, xkey = jax.random.split(key)
    w1, b1, w2, b2 = init_params(pkey, d_input, d_output, layer1)
    w1_p, b1_p, w2_p, b2_p = pad_params(w1, b1, w2, b2)
    state = jax.random.normal(xkey, (batch, d_input), jnp.float32)

    out = dqn_forward(state, w1_p, b1_p, w2_p, b2_p, d_output=d_output)
    out = jax.block_until_ready(out)

    # Pure-JAX f32 reference (bf16 MXU inputs -> loosened tolerance).
    ref = jnp.maximum(state @ w1 + b1, 0.0) @ w2 + b2
    assert out.shape == (batch, d_output)
    assert jnp.allclose(out, ref, atol=5e-2, rtol=5e-2), \
        float(jnp.max(jnp.abs(out - ref)))

    print("KERNEL_OK")
</pallas_src>

<mosaic_0001>
module attributes {stable_mosaic.version = 11 : i64} {
  func.func @_dqn_kernel(%arg0: i32, %arg1: memref<128x16xf32, #tpu.memory_space<vmem>>, %arg2: memref<16x128xbf16, #tpu.memory_space<vmem>>, %arg3: memref<1x128xf32, #tpu.memory_space<vmem>>, %arg4: memref<128x128xbf16, #tpu.memory_space<vmem>>, %arg5: memref<1x128xf32, #tpu.memory_space<vmem>>, %arg6: memref<128x128xf32, #tpu.memory_space<vmem>>) attributes {dimension_semantics = [#tpu.dimension_semantics<parallel>], iteration_bounds = array<i64: 2>, scalar_prefetch = 0 : i64, scratch_operands = 0 : i64, tpu.core_type = #tpu.core_type<tc>, window_params = [{transform_indices = @transform_0, window_bounds = array<i64: 128, 16>}, {pipeline_mode = #tpu.pipeline_mode<synchronous>, transform_indices = @transform_1, window_bounds = array<i64: 16, 128>}, {pipeline_mode = #tpu.pipeline_mode<synchronous>, transform_indices = @transform_2, window_bounds = array<i64: 1, 128>}, {pipeline_mode = #tpu.pipeline_mode<synchronous>, transform_indices = @transform_3, window_bounds = array<i64: 128, 128>}, {pipeline_mode = #tpu.pipeline_mode<synchronous>, transform_indices = @transform_4, window_bounds = array<i64: 1, 128>}, {transform_indices = @transform_5, window_bounds = array<i64: 128, 128>}]} {
    %c0 = arith.constant 0 : index
    %c0_0 = arith.constant 0 : index
    %0 = vector.load %arg1[%c0, %c0_0] : memref<128x16xf32, #tpu.memory_space<vmem>>, vector<128x16xf32>
    %1 = arith.truncf %0 : vector<128x16xf32> to vector<128x16xbf16>
    %c0_1 = arith.constant 0 : index
    %c0_2 = arith.constant 0 : index
    %2 = vector.load %arg2[%c0_1, %c0_2] : memref<16x128xbf16, #tpu.memory_space<vmem>>, vector<16x128xbf16>
    %cst = arith.constant dense<0.000000e+00> : vector<128x128xf32>
    %3 = tpu.matmul %1, %2, %cst {dimension_numbers = #tpu.dot_dimension_numbers<[1], [0], [0], [1], [0, 0, 1, 1], [], []>} : vector<128x16xbf16>, vector<16x128xbf16>, vector<128x128xf32> -> vector<128x128xf32>
    %c0_3 = arith.constant 0 : index
    %c0_4 = arith.constant 0 : index
    %4 = vector.load %arg3[%c0_3, %c0_4] : memref<1x128xf32, #tpu.memory_space<vmem>>, vector<1x128xf32>
    %5 = vector.broadcast %4 : vector<1x128xf32> to vector<128x128xf32>
    %6 = arith.addf %3, %5 : vector<128x128xf32>
    %cst_5 = arith.constant 0.000000e+00 : f32
    %7 = vector.broadcast %cst_5 : f32 to vector<128x128xf32>
    %8 = arith.maximumf %6, %7 : vector<128x128xf32>
    %9 = arith.truncf %8 : vector<128x128xf32> to vector<128x128xbf16>
    %c0_6 = arith.constant 0 : index
    %c0_7 = arith.constant 0 : index
    %10 = vector.load %arg4[%c0_6, %c0_7] : memref<128x128xbf16, #tpu.memory_space<vmem>>, vector<128x128xbf16>
    %cst_8 = arith.constant dense<0.000000e+00> : vector<128x128xf32>
    %11 = tpu.matmul %9, %10, %cst_8 {dimension_numbers = #tpu.dot_dimension_numbers<[1], [0], [0], [1], [0, 0, 1, 1], [], []>} : vector<128x128xbf16>, vector<128x128xbf16>, vector<128x128xf32> -> vector<128x128xf32>
    %c0_9 = arith.constant 0 : index
    %c0_10 = arith.constant 0 : index
    %12 = vector.load %arg5[%c0_9, %c0_10] : memref<1x128xf32, #tpu.memory_space<vmem>>, vector<1x128xf32>
    %13 = vector.broadcast %12 : vector<1x128xf32> to vector<128x128xf32>
    %14 = arith.addf %11, %13 : vector<128x128xf32>
    %c0_11 = arith.constant 0 : index
    %c0_12 = arith.constant 0 : index
    %15 = vector.load %arg6[%c0_11, %c0_12] : memref<128x128xf32, #tpu.memory_space<vmem>>, vector<128x128xf32>
    tpu.vector_store %arg6[%c0_11, %c0_12], %14 {strides = array<i32>} : memref<128x128xf32, #tpu.memory_space<vmem>>, vector<128x128xf32>,
    return
  }
  func.func @transform_0(%arg0: i32) -> (i32, i32) {
    %c0_i32 = arith.constant 0 : i32
    %c0_i32_0 = arith.constant 0 : i32
    return %arg0, %c0_i32 : i32, i32
  }
  func.func @transform_1(%arg0: i32) -> (i32, i32) {
    %c0_i32 = arith.constant 0 : i32
    %c0_i32_0 = arith.constant 0 : i32
    %c0_i32_1 = arith.constant 0 : i32
    return %c0_i32, %c0_i32_0 : i32, i32
  }
  func.func @transform_2(%arg0: i32) -> (i32, i32) {
    %c0_i32 = arith.constant 0 : i32
    %c0_i32_0 = arith.constant 0 : i32
    %c0_i32_1 = arith.constant 0 : i32
    return %c0_i32, %c0_i32_0 : i32, i32
  }
  func.func @transform_3(%arg0: i32) -> (i32, i32) {
    %c0_i32 = arith.constant 0 : i32
    %c0_i32_0 = arith.constant 0 : i32
    %c0_i32_1 = arith.constant 0 : i32
    return %c0_i32, %c0_i32_0 : i32, i32
  }
  func.func @transform_4(%arg0: i32) -> (i32, i32) {
    %c0_i32 = arith.constant 0 : i32
    %c0_i32_0 = arith.constant 0 : i32
    %c0_i32_1 = arith.constant 0 : i32
    return %c0_i32, %c0_i32_0 : i32, i32
  }
  func.func @transform_5(%arg0: i32) -> (i32, i32) {
    %c0_i32 = arith.constant 0 : i32
    %c0_i32_0 = arith.constant 0 : i32
    return %arg0, %c0_i32 : i32, i32
  }
}

</mosaic_0001>

<bundles_post_ra>
// kernel: dqn_forward.1
= control target key start
LH: loop header
LB: loop body
LE: loop exit
PB: predicated region body
PF: predicated region fallthrough
CT: control target
= control target key end

     0   :  { %s830_s18 = smov 0   ;;  %s931_s0 = inlined_call_operand.vmem [shape: f32[256,16], index: 0, kind: input, shape index: {}]   ;;  %s932_s1 = inlined_call_operand.vmem [shape: bf16[16,128], index: 1, kind: input, shape index: {}]   ;;  %s933_s2 = inlined_call_operand.vmem [shape: f32[1,128], index: 2, kind: input, shape index: {}]   ;;  %s934_s3 = inlined_call_operand.vmem [shape: bf16[128,128], index: 3, kind: input, shape index: {}]   ;;  %s935_s4 = inlined_call_operand.vmem [shape: f32[1,128], index: 4, kind: input, shape index: {}]   ;;  %s936_s5 = inlined_call_operand.vmem [shape: f32[256,128], index: 5, kind: output, shape index: {}]  }
   0x1 LB: > { %s654_s19 = sadd.s32 4294967295, %s798_s18   ;;  %p658_p0 = scmp.ge.s32.totalorder %s798_s18, 1  ;;  %s798_s18 = sphi %s830_s18, %s15_s18  }
   0x2   : > { %p188_p1 = scmp.lt.s32.totalorder %s798_s18, 3 }
   0x4   : > { %p189_p2 = pnand %p658_p0, %p188_p1 }
   0x5   : > { %v783_v0 = vld [vmem:[%s932_s1] sm:$0xff] (!%p189_p2)   ;;  %s659_s22 = sshll.u32 (!%p189_p2), %s654_s19, 4  ;;  %v785_v2 = vld [vmem:[%s934_s3 + $0x8] sm:$0xff] (!%p189_p2)   ;;  %v786_v3 = vld [vmem:[%s934_s3 + $0x10] sm:$0xff] (!%p189_p2)   ;;  %vm268_vm0 = vcmask (!%p189_p2), 130048  }
   0x6   : > { %192 = sbr.rel (%p189_p2) target bundleno = 484 (0x1e4), region = 40  ;;  %p217_p3 = scmp.lt.s32.totalorder (!%p189_p2), %s659_s22, 31  ;;  %709 = vmatprep.subr.bf16.mxu0 (!%p189_p2), %v783_v0  ;;  %v784_v1 = vld [vmem:[%s934_s3] sm:$0xff] (!%p189_p2)   ;;  %v787_v15 = vld [vmem:[%s934_s3 + $0x18] sm:$0xff] (!%p189_p2)   ;;  %v789_v23 = vld [vmem:[%s934_s3 + $0x28] sm:$0xff] (!%p189_p2)  }
   0x7   : > { %710 = vmatpush3.bf16.msra.mxu0 (!%p189_p2), %v783_v0  ;;  %759 = vmatprep.subr.bf16.mxu1 (!%p189_p2), %v784_v1  ;;  %v788_v20 = vld [vmem:[%s934_s3 + $0x20] sm:$0xff] (!%p189_p2)   ;;  %v790_v31 = vld [vmem:[%s934_s3 + $0x30] sm:$0xff] (!%p189_p2)   ;;  %v791_v32 = vld [vmem:[%s934_s3 + $0x38] sm:$0xff] (!%p189_p2)  }
   0x8   : > { %727 = vmatprep.subr.bf16.mxu0 (!%p189_p2), %v784_v1  ;;  %767 = vmatpush3.bf16.msra.mxu1 (!%p189_p2), %v784_v1  ;;  %v663_v33 = vld [vmem:[%s933_s2] ss:$0 sm:$0xff] (!%p189_p2) }
   0x9   : > { %760 = vmatprep.subr.bf16.mxu1 (!%p189_p2), %v785_v2 }
   0xc   : > { %768 = vmatpush3.bf16.msra.mxu1 (!%p189_p2), %v785_v2 }
   0xd   : > { %s938_s22 = smov (!%p217_p3, %s659_s22), 31  ;;  %761 = vmatprep.subr.bf16.mxu1 %v786_v3 }
   0xe   : > { %s660_s27 = sshll.u32 %s938_s22, 3 }
   0xf   : > { %s855_s30 = scalar_lea.vmem %s931_s0, %s660_s27  ;;  %s910_s26 = scalar_lea.vmem %s936_s5, %s660_s27 }
  0x10   : > { %v229_v4 = vld [vmem:[%s855_s30] sm:$0xff]  ;;  %v230_v5 = vld [vmem:[%s855_s30 + $0x8] sm:$0xff]  ;;  %v231_v6 = vld [vmem:[%s855_s30 + $0x10] sm:$0xff]  ;;  %769 = vmatpush3.bf16.msra.mxu1 %v786_v3 }
  0x11   : > { %v245_v7 = vpack.c.bf16 %v230_v5, %v229_v4  ;;  %v232_v8 = vld [vmem:[%s855_s30 + $0x18] sm:$0xff]  ;;  %v233_v9 = vld [vmem:[%s855_s30 + $0x20] sm:$0xff]  ;;  %v234_v10 = vld [vmem:[%s855_s30 + $0x28] sm:$0xff]  ;;  %762 = vmatprep.subr.bf16.mxu1 %v787_v15 }
  0x12   : > { %v246_v11 = vpack.c.bf16 %v232_v8, %v231_v6  ;;  %v247_v12 = vpack.c.bf16 %v234_v10, %v233_v9  ;;  %v235_v13 = vld [vmem:[%s855_s30 + $0x30] sm:$0xff]  ;;  %v236_v14 = vld [vmem:[%s855_s30 + $0x38] sm:$0xff]  ;;  %v237_v16 = vld [vmem:[%s855_s30 + $0x40] sm:$0xff] }
  0x13   : > { %711 = vmatprep.mubr.msk.bf16.mxu0 %vm268_vm0, %v245_v7  ;;  %v238_v17 = vld [vmem:[%s855_s30 + $0x48] sm:$0xff]  ;;  %v248_v18 = vpack.c.bf16 %v236_v14, %v235_v13  ;;  %v239_v21 = vld [vmem:[%s855_s30 + $0x50] sm:$0xff]  ;;  %v240_v22 = vld [vmem:[%s855_s30 + $0x58] sm:$0xff] }
  0x14   : > { %712 = vmatmul.mubr.msk.bf16.vlgmr.msra.gmra.mrb[0].mxu0 %vm268_vm0, %v246_v11  ;;  %v249_v19 = vpack.c.bf16 %v238_v17, %v237_v16  ;;  %770 = vmatpush3.bf16.msra.mxu1 %v787_v15  ;;  %v241_v24 = vld [vmem:[%s855_s30 + $0x60] sm:$0xff]  ;;  %v242_v25 = vld [vmem:[%s855_s30 + $0x68] sm:$0xff]  ;;  %v250_v26 = vpack.c.bf16 %v240_v22, %v239_v21  ;;  %v243_v28 = vld [vmem:[%s855_s30 + $0x70] sm:$0xff] }
  0x15   : > { %715 = vmatprep.mubr.msk.bf16.mxu0 %vm268_vm0, %v247_v12  ;;  %728 = vmatpush3.bf16.msra.mxu0 %v784_v1  ;;  %v251_v27 = vpack.c.bf16 %v242_v25, %v241_v24  ;;  %v244_v29 = vld [vmem:[%s855_s30 + $0x78] sm:$0xff] }
  0x16   : > { %729 = vmatprep.subr.bf16.mxu0 %v785_v2  ;;  %763 = vmatprep.subr.bf16.mxu1 %v788_v20  ;;  %v252_v30 = vpack.c.bf16 %v244_v29, %v243_v28 }
  0x18   : > { %771 = vmatpush3.bf16.msra.mxu1 %v788_v20 }
  0x19   : > { %730 = vmatpush3.bf16.msra.mxu0 %v785_v2  ;;  %764 = vmatprep.subr.bf16.mxu1 %v789_v23 }
  0x1a   : > { %731 = vmatprep.subr.bf16.mxu0 %v786_v3 }
  0x1c   : > { %716 = vmatmul.mubr.msk.bf16.gmra.mrb[4].mxu0 %vm268_vm0, %v248_v18  ;;  %772 = vmatpush3.bf16.msra.mxu1 %v789_v23 }
  0x1d   : > { %719 = vmatprep.mubr.msk.bf16.mxu0 %vm268_vm0, %v249_v19  ;;  %732 = vmatpush3.bf16.msra.mxu0 %v786_v3 }
  0x1e   : > { %733 = vmatprep.subr.bf16.mxu0 %v787_v15  ;;  %765 = vmatprep.subr.bf16.mxu1 %v790_v31 }
  0x20   : > { %773 = vmatpush3.bf16.msra.mxu1 %v790_v31 }
  0x21   : > { %734 = vmatpush3.bf16.msra.mxu0 %v787_v15  ;;  %766 = vmatprep.subr.bf16.mxu1 %v791_v32 }
  0x22   : > { %735 = vmatprep.subr.bf16.mxu0 %v788_v20 }
  0x24   : > { %720 = vmatmul.mubr.msk.bf16.gmra.mrb[8].mxu0 %vm268_vm0, %v250_v26  ;;  %774 = vmatpush3.bf16.msra.mxu1 %v791_v32  ;;  %v673_v26 = vld [vmem:[%s935_s4] ss:$0 sm:$0xff] }
  0x25   : > { %723 = vmatprep.mubr.msk.bf16.mxu0 %vm268_vm0, %v251_v27  ;;  %736 = vmatpush3.bf16.msra.mxu0 %v788_v20 }
  0x26   : > { %737 = vmatprep.subr.bf16.mxu0 %v789_v23 }
  0x29   : > { %738 = vmatpush3.bf16.msra.mxu0 %v789_v23 }
  0x2a   : > { %739 = vmatprep.subr.bf16.mxu0 %v790_v31 }
  0x2c   : > { %724 = vmatmul.mubr.msk.bf16.gmra.mrb[12].mxu0 %vm268_vm0, %v252_v30 }
  0x2d   : > { %740 = vmatpush3.bf16.msra.mxu0 %v790_v31 }
  0x2e   : > { %741 = vmatprep.subr.bf16.mxu0 %v791_v32 }
  0x31   : > { %742 = vmatpush3.bf16.msra.mxu0 %v791_v32 }
  0xe7   : > { %v713_v34 = vpop.f32.mrb[0].mxu0 }
  0xe8   : > { %v336_v35 = vadd.f32 %v713_v34, %v663_v33  ;;  %v327_v36 = vpop.f32.mrb[1].mxu0 }
  0xe9   : > { %v328_v37 = vadd.f32 %v663_v33, %v327_v36  ;;  %v714_v38 = vpop.f32.mrb[2].mxu0 }
  0xea   : > { %v339_v39 = vadd.f32 %v714_v38, %v663_v33  ;;  %v330_v40 = vpop.f32.mrb[3].mxu0  ;;  %v392_v42 = vmax.f32 %v336_v35, 0.0 }
  0xeb   : > { %v331_v41 = vadd.f32 %v663_v33, %v330_v40  ;;  %v390_v44 = vmax.f32 %v328_v37, 0.0 }
  0xec   : > { %v393_v43 = vmax.f32 %v339_v39, 0.0 }
  0xed   : > { %v391_v45 = vmax.f32 %v331_v41, 0.0 }
  0xee   : > { %v407_v46 = vpack.c.bf16 %v393_v43, %v392_v42 }
  0xef   : > { %v406_v47 = vpack.c.bf16 %v391_v45, %v390_v44  ;;  %v717_v48 = vpop.f32.mrb[4].mxu0 }
  0xf0   : > { %v352_v49 = vadd.f32 %v717_v48, %v663_v33  ;;  %v343_v50 = vpop.f32.mrb[5].mxu0 }
  0xf1   : > { %v344_v51 = vadd.f32 %v663_v33, %v343_v50  ;;  %v718_v52 = vpop.f32.mrb[6].mxu0  ;;  %743 = vmatprep.mubr.bf16.mxu0 %v406_v47 }
  0xf2   : > { %v355_v53 = vadd.f32 %v718_v52, %v663_v33  ;;  %v346_v54 = vpop.f32.mrb[7].mxu0  ;;  %744 = vmatmul.mubr.bf16.vlgmr.msra.gmra.mrb[16].mxu0 %v407_v46  ;;  %v396_v56 = vmax.f32 %v352_v49, 0.0 }
  0xf3   : > { %v347_v55 = vadd.f32 %v663_v33, %v346_v54  ;;  %v394_v58 = vmax.f32 %v344_v51, 0.0 }
  0xf4   : > { %v397_v57 = vmax.f32 %v355_v53, 0.0 }
  0xf5   : > { %v395_v59 = vmax.f32 %v347_v55, 0.0 }
  0xf6   : > { %v409_v60 = vpack.c.bf16 %v397_v57, %v396_v56 }
  0xf7   : > { %v721_v61 = vpop.f32.mrb[8].mxu0  ;;  %v408_v62 = vpack.c.bf16 %v395_v59, %v394_v58 }
  0xf8   : > { %v368_v63 = vadd.f32 %v721_v61, %v663_v33  ;;  %v359_v0 = vpop.f32.mrb[9].mxu0 }
  0xf9   : > { %v360_v1 = vadd.f32 %v663_v33, %v359_v0  ;;  %v722_v2 = vpop.f32.mrb[10].mxu0  ;;  %747 = vmatprep.mubr.bf16.mxu1 %v408_v62 }
  0xfa   : > { %v371_v3 = vadd.f32 %v722_v2, %v663_v33  ;;  %v362_v4 = vpop.f32.mrb[11].mxu0  ;;  %748 = vmatmul.mubr.bf16.vlgmr.msra.gmra.mrb[0].mxu1 %v409_v60  ;;  %v400_v6 = vmax.f32 %v368_v63, 0.0 }
  0xfb   : > { %v363_v5 = vadd.f32 %v663_v33, %v362_v4  ;;  %v398_v8 = vmax.f32 %v360_v1, 0.0 }
  0xfc   : > { %v401_v7 = vmax.f32 %v371_v3, 0.0 }
  0xfd   : > { %v399_v9 = vmax.f32 %v363_v5, 0.0 }
  0xfe   : > { %v411_v10 = vpack.c.bf16 %v401_v7, %v400_v6 }
  0xff   : > { %v410_v11 = vpack.c.bf16 %v399_v9, %v398_v8  ;;  %v725_v12 = vpop.f32.mrb[12].mxu0 }
 0x100   : > { %v384_v13 = vadd.f32 %v725_v12, %v663_v33  ;;  %v375_v14 = vpop.f32.mrb[13].mxu0 }
 0x101   : > { %v376_v15 = vadd.f32 %v663_v33, %v375_v14  ;;  %v726_v16 = vpop.f32.mrb[14].mxu0  ;;  %751 = vmatprep.mubr.bf16.mxu1 %v410_v11 }
 0x102   : > { %v387_v17 = vadd.f32 %v726_v16, %v663_v33  ;;  %v378_v18 = vpop.f32.mrb[15].mxu0  ;;  %752 = vmatmul.mubr.bf16.gmra.mrb[4].mxu1 %v411_v10  ;;  %v404_v20 = vmax.f32 %v384_v13, 0.0 }
 0x103   : > { %v379_v19 = vadd.f32 %v663_v33, %v378_v18  ;;  %v402_v22 = vmax.f32 %v376_v15, 0.0 }
 0x104   : > { %v405_v21 = vmax.f32 %v387_v17, 0.0 }
 0x105   : > { %v403_v23 = vmax.f32 %v379_v19, 0.0 }
 0x106   : > { %v413_v24 = vpack.c.bf16 %v405_v21, %v404_v20 }
 0x107   : > { %v412_v25 = vpack.c.bf16 %v403_v23, %v402_v22 }
 0x109   : > { %755 = vmatprep.mubr.bf16.mxu1 %v412_v25 }
 0x10a   : > { %756 = vmatmul.mubr.bf16.gmra.mrb[8].mxu1 %v413_v24 }
 0x1c5   : > { %v745_v27 = vpop.f32.mrb[16].mxu0 }
 0x1c6   : > { %v528_v28 = vadd.f32 %v745_v27, %v673_v26  ;;  %v519_v29 = vpop.f32.mrb[17].mxu0 }
 0x1c7   : > { %v520_v30 = vadd.f32 %v673_v26, %v519_v29  ;;  %v746_v31 = vpop.f32.mrb[18].mxu0 }
 0x1c8   : > { %584 = vst [vmem:[%s910_s26 + $0x10] sm:$0xff] %v528_v28  ;;  %v531_v32 = vadd.f32 %v746_v31, %v673_v26  ;;  %v522_v33 = vpop.f32.mrb[19].mxu0 }
 0x1c9   : > { %582 = vst [vmem:[%s910_s26] sm:$0xff] %v520_v30  ;;  %v523_v34 = vadd.f32 %v673_v26, %v522_v33 }
 0x1ca   : > { %585 = vst [vmem:[%s910_s26 + $0x18] sm:$0xff] %v531_v32 }
 0x1cb   : > { %583 = vst [vmem:[%s910_s26 + $0x8] sm:$0xff] %v523_v34 }
 0x1cd   : > { %v749_v35 = vpop.f32.mrb[0].mxu1 }
 0x1ce   : > { %v544_v36 = vadd.f32 %v749_v35, %v673_v26  ;;  %v535_v37 = vpop.f32.mrb[1].mxu1 }
 0x1cf   : > { %v536_v38 = vadd.f32 %v673_v26, %v535_v37  ;;  %v750_v39 = vpop.f32.mrb[2].mxu1 }
 0x1d0   : > { %588 = vst [vmem:[%s910_s26 + $0x30] sm:$0xff] %v544_v36  ;;  %v547_v40 = vadd.f32 %v750_v39, %v673_v26  ;;  %v538_v41 = vpop.f32.mrb[3].mxu1 }
 0x1d1   : > { %586 = vst [vmem:[%s910_s26 + $0x20] sm:$0xff] %v536_v38  ;;  %v539_v42 = vadd.f32 %v673_v26, %v538_v41 }
 0x1d2   : > { %589 = vst [vmem:[%s910_s26 + $0x38] sm:$0xff] %v547_v40 }
 0x1d3   : > { %587 = vst [vmem:[%s910_s26 + $0x28] sm:$0xff] %v539_v42 }
 0x1d5   : > { %v753_v43 = vpop.f32.mrb[4].mxu1 }
 0x1d6   : > { %v560_v44 = vadd.f32 %v753_v43, %v673_v26  ;;  %v551_v45 = vpop.f32.mrb[5].mxu1 }
 0x1d7   : > { %v552_v46 = vadd.f32 %v673_v26, %v551_v45  ;;  %v754_v47 = vpop.f32.mrb[6].mxu1 }
 0x1d8   : > { %592 = vst [vmem:[%s910_s26 + $0x50] sm:$0xff] %v560_v44  ;;  %v563_v48 = vadd.f32 %v754_v47, %v673_v26  ;;  %v554_v49 = vpop.f32.mrb[7].mxu1 }
 0x1d9   : > { %590 = vst [vmem:[%s910_s26 + $0x40] sm:$0xff] %v552_v46  ;;  %v555_v50 = vadd.f32 %v673_v26, %v554_v49 }
 0x1da   : > { %593 = vst [vmem:[%s910_s26 + $0x58] sm:$0xff] %v563_v48 }
 0x1db   : > { %591 = vst [vmem:[%s910_s26 + $0x48] sm:$0xff] %v555_v50 }
 0x1dd   : > { %v757_v51 = vpop.f32.mrb[8].mxu1 }
 0x1de   : > { %v576_v52 = vadd.f32 %v757_v51, %v673_v26  ;;  %v567_v53 = vpop.f32.mrb[9].mxu1 }
 0x1df   : > { %v568_v54 = vadd.f32 %v673_v26, %v567_v53  ;;  %v758_v55 = vpop.f32.mrb[10].mxu1 }
 0x1e0   : > { %596 = vst [vmem:[%s910_s26 + $0x70] sm:$0xff] %v576_v52  ;;  %v579_v56 = vadd.f32 %v758_v55, %v673_v26  ;;  %v570_v57 = vpop.f32.mrb[11].mxu1 }
 0x1e1   : > { %594 = vst [vmem:[%s910_s26 + $0x60] sm:$0xff] %v568_v54  ;;  %v571_v58 = vadd.f32 %v673_v26, %v570_v57 }
 0x1e2   : > { %597 = vst [vmem:[%s910_s26 + $0x78] sm:$0xff] %v579_v56 }
 0x1e3   : > { %595 = vst [vmem:[%s910_s26 + $0x68] sm:$0xff] %v571_v58 }
 0x1e4 PF: > { %s15_s18 = sadd.s32 1, %s798_s18  }
 0x1e5   : > { %p12_p4 = scmp.ge.s32.totalorder %s15_s18, 4  }
 0x1e7   :  { %14 = sbr.rel (!%p12_p4) target bundleno = 1 (0x1), region = 70 }

</bundles_post_ra>
